<compile_context>
chip_gen: v7x
topology: tpu7x:2x2x1
jax: 0.10.0
libtpu: 0.0.40
codegen_flags: <defaults>
</compile_context>

<pallas_src>
import jax
import jax.numpy as jnp
from jax.experimental import pallas as pl
from jax.experimental.pallas import tpu as pltpu


# ----------------------------------------------------------------------------
# Kernel: one row-tile of the folded GEMM.
# Invariant: each output row depends only on its own input row, so garbage rows
# in a ragged last tile are harmless (their writes fall out of bounds and are
# discarded by the pipeline).
# ----------------------------------------------------------------------------
def _itq_kernel(x_ref, w_ref, b_ref, out_ref):
    x = x_ref[...].astype(jnp.float32)            # VPU cast, hidden under DMA
    acc = jnp.dot(x, w_ref[...], preferred_element_type=jnp.float32)
    out_ref[...] = (acc + b_ref[...]).astype(out_ref.dtype)


# ----------------------------------------------------------------------------
# Host-side helpers
# ----------------------------------------------------------------------------
def _round_up(n, m):
    return ((n + m - 1) // m) * m


def _vmem_capacity_bytes():
    """Per-TensorCore VMEM capacity (v5e/v6e: 128 MiB, v7x: 64 MiB)."""
    try:
        return int(pltpu.get_tpu_info().vmem_capacity_bytes)
    except Exception:
        pass
    try:
        kind = jax.devices()[0].device_kind.lower()
    except Exception:
        kind = ""
    if "v5" in kind or "v6" in kind:
        return 128 * 1024 * 1024
    return 64 * 1024 * 1024  # v7x / unknown: conservative


def _choose_tm(n_rows, d, nbit, x_bytes, w_bytes, out_bytes, vmem_cap):
    """Largest row tile whose double-buffered working set fits a safe budget.

    BlockSpec double-buffers *every* input (even constant-index W / bias), so
    count them twice.  Maximizing tm against the budget automatically gives
    multi-MiB x tiles, amortizing the ~0.35 us per-grid-step overhead.
    """
    budget = int(0.45 * vmem_cap)
    weights = 2 * (d * nbit * w_bytes) + 2 * (nbit * 4)          # W + bias, x2
    per_row = 2 * (d * x_bytes) + 2 * (nbit * out_bytes)          # x + out, x2
    avail = budget - weights
    if avail < per_row * 8:
        # TODO(synk): weight block alone too big for VMEM (very large D); needs
        # the K-tiled accumulator variant before this regime is usable.
        return 8
    tm = (avail // per_row // 8) * 8
    tm = min(tm, 8192)
    # v7x megacore: make sure the "parallel" row axis has >= 2 grid steps.
    if n_rows > 8:
        tm = min(tm, _round_up(pl.cdiv(n_rows, 2), 8))
    tm = min(tm, max(8, _round_up(n_rows, 8)))
    return max(8, tm)


# ----------------------------------------------------------------------------
# Wrapper
# ----------------------------------------------------------------------------
def itq_eval(x, mean_, components_, explained_variance_, R,
             whiten=True, out_dtype=jnp.float32, tm=None):
    """Eval-mode ITQ forward as a single streaming GEMM.

    v_tilde = ((x - mean) @ components.T) / sqrt(var) @ R  ==  x @ W + bias
    with the fold done in f32 on the host.  x is streamed in its native dtype
    (no host-side cast/pad passes over HBM).
    """
    N, D = x.shape
    nbit = R.shape[0]

    # ---- algebraic fold of mean / PCA / whiten / rotation (f32 host math) ----
    compT = components_.astype(jnp.float32).T                     # (D, nbit)
    if whiten:
        scale = 1.0 / jnp.sqrt(explained_variance_.astype(jnp.float32))
        compT = compT * scale[None, :]
    W = compT @ R.astype(jnp.float32)                             # (D, nbit) f32
    bias = -(mean_.astype(jnp.float32)[None, :] @ W)              # (1, nbit) f32

    x_bytes = jnp.dtype(x.dtype).itemsize
    w_bytes = 4
    out_bytes = jnp.dtype(out_dtype).itemsize

    vmem_cap = _vmem_capacity_bytes()
    if tm is None:
        tm = _choose_tm(N, D, nbit, x_bytes, w_bytes, out_bytes, vmem_cap)
    tm = max(8, _round_up(tm, 8))

    grid = (pl.cdiv(N, tm),)   # ragged last tile handled by Pallas, no padding

    needed_vmem = (2 * (tm * D * x_bytes + tm * nbit * out_bytes)
                   + 2 * (D * nbit * w_bytes + nbit * 4))
    vmem_limit = min(int(0.9 * vmem_cap),
                     max(2 * needed_vmem, 32 * 1024 * 1024))

    cost = pl.CostEstimate(
        flops=2 * N * D * nbit,
        transcendentals=0,
        bytes_accessed=(N * D * x_bytes + N * nbit * out_bytes
                        + D * nbit * w_bytes + nbit * 4),
    )

    out = pl.pallas_call(
        _itq_kernel,
        out_shape=jax.ShapeDtypeStruct((N, nbit), out_dtype),
        grid_spec=pl.GridSpec(
            grid=grid,
            in_specs=[
                pl.BlockSpec((tm, D), lambda i: (i, 0)),       # x row tile
                pl.BlockSpec((D, nbit), lambda i: (0, 0)),     # folded weight
                pl.BlockSpec((1, nbit), lambda i: (0, 0)),     # folded bias
            ],
            out_specs=pl.BlockSpec((tm, nbit), lambda i: (i, 0)),
        ),
        compiler_params=pltpu.CompilerParams(
            dimension_semantics=("parallel",),   # rows shard across TCs (v7x)
            vmem_limit_bytes=vmem_limit,
        ),
        cost_estimate=cost,
    )(x, W, bias)

    return out


# ----------------------------------------------------------------------------
# Self-test
# ----------------------------------------------------------------------------
if __name__ == "__main__":
    D, nbit = 32, 16
    key = jax.random.PRNGKey(0)
    kx, kr, kc, km, kv = jax.random.split(key, 5)

    # R: orthogonal nbit x nbit (like torch.svd of a random gaussian).
    R_raw = jax.random.normal(kr, (nbit, nbit), dtype=jnp.float32)
    U, _, _ = jnp.linalg.svd(R_raw)
    R = U[:, :nbit]

    # PCA "components_": orthonormal rows (nbit, D).
    C_raw = jax.random.normal(kc, (nbit, D), dtype=jnp.float32)
    _, _, Vt = jnp.linalg.svd(C_raw, full_matrices=False)
    components_ = Vt                                             # (nbit, D)

    mean_ = jax.random.normal(km, (D,), dtype=jnp.float32)
    explained_variance_ = jax.random.uniform(
        kv, (nbit,), dtype=jnp.float32, minval=0.5, maxval=2.0)

    whiten = True

    def reference(x):
        xc = x - mean_.reshape(1, -1)
        x_pca = xc @ components_.T
        if whiten:
            x_pca = x_pca / jnp.sqrt(explained_variance_.reshape(1, -1))
        return x_pca @ R

    ok = True

    # 1) Divisible batch: tight tolerance (everything is f32 end-to-end).
    N = 16
    x = jax.random.normal(kx, (N, D), dtype=jnp.float32)
    out = jax.block_until_ready(
        itq_eval(x, mean_, components_, explained_variance_, R, whiten=whiten))
    ref = reference(x)
    ok &= out.shape == (N, nbit)
    ok &= bool(jnp.allclose(out, ref, atol=1e-4, rtol=1e-4))

    # 2) Ragged batch (N not a multiple of the row tile): exercises the
    #    pad-free last partial tile path.
    N2 = 13
    x2 = jax.random.normal(kx, (N2, D), dtype=jnp.float32)
    out2 = jax.block_until_ready(
        itq_eval(x2, mean_, components_, explained_variance_, R, whiten=whiten))
    ref2 = reference(x2)
    ok &= out2.shape == (N2, nbit)
    ok &= bool(jnp.allclose(out2, ref2, atol=1e-4, rtol=1e-4))

    # 3) bf16 input streaming (no host cast: caller-provided dtype is streamed
    #    as-is; the kernel upcasts on the VPU).  Loose tolerance.
    out3 = jax.block_until_ready(
        itq_eval(x.astype(jnp.bfloat16), mean_, components_,
                 explained_variance_, R, whiten=whiten))
    ok &= out3.shape == (N, nbit) and out3.dtype == jnp.float32
    ok &= bool(jnp.allclose(out3, ref, atol=1e-1, rtol=1e-1))

    assert ok, "ITQ Pallas kernel mismatch vs reference"
    print("KERNEL_OK")
</pallas_src>

<mosaic_0001>
module attributes {stable_mosaic.version = 11 : i64} {
  func.func @_itq_kernel(%arg0: i32, %arg1: memref<8x32xf32, #tpu.memory_space<vmem>>, %arg2: memref<32x16xf32, #tpu.memory_space<vmem>>, %arg3: memref<1x16xf32, #tpu.memory_space<vmem>>, %arg4: memref<8x16xf32, #tpu.memory_space<vmem>>) attributes {dimension_semantics = [#tpu.dimension_semantics<parallel>], iteration_bounds = array<i64: 2>, scalar_prefetch = 0 : i64, scratch_operands = 0 : i64, tpu.core_type = #tpu.core_type<tc>, window_params = [{transform_indices = @transform_0, window_bounds = array<i64: 8, 32>}, {pipeline_mode = #tpu.pipeline_mode<synchronous>, transform_indices = @transform_1, window_bounds = array<i64: 32, 16>}, {pipeline_mode = #tpu.pipeline_mode<synchronous>, transform_indices = @transform_2, window_bounds = array<i64: 1, 16>}, {transform_indices = @transform_3, window_bounds = array<i64: 8, 16>}]} {
    %c0 = arith.constant 0 : index
    %c0_0 = arith.constant 0 : index
    %0 = vector.load %arg1[%c0, %c0_0] : memref<8x32xf32, #tpu.memory_space<vmem>>, vector<8x32xf32>
    %c0_1 = arith.constant 0 : index
    %c0_2 = arith.constant 0 : index
    %1 = vector.load %arg2[%c0_1, %c0_2] : memref<32x16xf32, #tpu.memory_space<vmem>>, vector<32x16xf32>
    %cst = arith.constant dense<0.000000e+00> : vector<8x16xf32>
    %2 = tpu.matmul %0, %1, %cst {dimension_numbers = #tpu.dot_dimension_numbers<[1], [0], [0], [1], [0, 0, 1, 1], [], []>} : vector<8x32xf32>, vector<32x16xf32>, vector<8x16xf32> -> vector<8x16xf32>
    %c0_3 = arith.constant 0 : index
    %c0_4 = arith.constant 0 : index
    %3 = vector.load %arg3[%c0_3, %c0_4] : memref<1x16xf32, #tpu.memory_space<vmem>>, vector<1x16xf32>
    %4 = vector.broadcast %3 : vector<1x16xf32> to vector<8x16xf32>
    %5 = arith.addf %2, %4 : vector<8x16xf32>
    %c0_5 = arith.constant 0 : index
    %c0_6 = arith.constant 0 : index
    %6 = vector.load %arg4[%c0_5, %c0_6] : memref<8x16xf32, #tpu.memory_space<vmem>>, vector<8x16xf32>
    tpu.vector_store %arg4[%c0_5, %c0_6], %5 {strides = array<i32>} : memref<8x16xf32, #tpu.memory_space<vmem>>, vector<8x16xf32>,
    return
  }
  func.func @transform_0(%arg0: i32) -> (i32, i32) {
    %c0_i32 = arith.constant 0 : i32
    %c0_i32_0 = arith.constant 0 : i32
    return %arg0, %c0_i32 : i32, i32
  }
  func.func @transform_1(%arg0: i32) -> (i32, i32) {
    %c0_i32 = arith.constant 0 : i32
    %c0_i32_0 = arith.constant 0 : i32
    %c0_i32_1 = arith.constant 0 : i32
    return %c0_i32, %c0_i32_0 : i32, i32
  }
  func.func @transform_2(%arg0: i32) -> (i32, i32) {
    %c0_i32 = arith.constant 0 : i32
    %c0_i32_0 = arith.constant 0 : i32
    %c0_i32_1 = arith.constant 0 : i32
    return %c0_i32, %c0_i32_0 : i32, i32
  }
  func.func @transform_3(%arg0: i32) -> (i32, i32) {
    %c0_i32 = arith.constant 0 : i32
    %c0_i32_0 = arith.constant 0 : i32
    return %arg0, %c0_i32 : i32, i32
  }
}

</mosaic_0001>

<bundles_post_ra>
// kernel: tpu_custom_call.1
= control target key start
LH: loop header
LB: loop body
LE: loop exit
PB: predicated region body
PF: predicated region fallthrough
CT: control target
= control target key end

     0   :  { %8 = vsyncpa [#allocation3], 0  ;;  %s606_s0 = inlined_call_operand.vmem [shape: f32[16,32], index: 0, kind: input, shape index: {}]   ;;  %s607_s1 = inlined_call_operand.vmem [shape: f32[32,16], index: 1, kind: input, shape index: {}]   ;;  %s608_s2 = inlined_call_operand.vmem [shape: f32[1,16], index: 2, kind: input, shape index: {}]   ;;  %s609_s3 = inlined_call_operand.hbm [shape: f32[16,16], index: 3, kind: output, shape index: {}]  }
   0x1   :  { %10 = vsyncpa [#allocation3 + $0x1], 0  ;;  %s491_s12 = smov 0   ;;  %s493_s13 = smov 0  }
   0x2   :  { %s495_s14 = smov 0   ;;  %s497_s15 = smov 0  }
   0x3 LB: > { %s512_s16 = sadd.s32 4294967295, %s465_s15   ;;  %s327_s17 = sadd.s32 4294967294, %s465_s15   ;;  %s465_s15 = sphi %s497_s15, %s615_s15   ;;  %s461_s14 = sphi %s495_s14, %s614_s14   ;;  %s457_s13 = sphi %s493_s13, %s613_s13   ;;  %s453_s12 = sphi %s491_s12, %s612_s12  }
   0x4   : > { %s516_s18 = sadd.s32 1, %s465_s15   ;;  %s91_s19 = sadd.s32 1, %s461_s14 }
   0x5   : > { %s88_s20 = ssub.s32 %s465_s15, %s516_s18  ;;  %p101_p0 = scmp.ne.s32.totalorder %s461_s14, %s457_s13 }
   0x6   : > { %p89_p1 = scmp.eq.s32.totalorder %s88_s20, 0  ;;  %p102_p2 = scmp.eq.s32.totalorder %s512_s16, 1 }
   0x7   : > { %p107_p3 = scmp.ne.s32.totalorder %s457_s13, %s453_s12  ;;  %p108_p4 = scmp.eq.s32.totalorder %s327_s17, 1 }
   0x8   : > { %s527_s21 = scalar_select %p89_p1, %s461_s14, %s91_s19  }
   0x9   : > { %p529_p5 = por %p102_p2, %p101_p0  ;;  %p533_p6 = por %p108_p4, %p107_p3 }
   0xa   : > { %p330_p7 = scmp.ge.s32.totalorder %s465_s15, 1  ;;  %p139_p8 = scmp.lt.s32.totalorder %s465_s15, 3 }
   0xc   : > { %p140_p9 = pnand %p330_p7, %p139_p8 }
   0xd   : > { %v167_v0 = vld [vmem:[%s607_s1] sm:$0xff] (!%p140_p9)  ;;  %v168_v1 = vld [vmem:[%s607_s1 + $0x8] sm:$0xff] (!%p140_p9)  ;;  %v169_v2 = vld [vmem:[%s607_s1 + $0x10] sm:$0xff] (!%p140_p9)  ;;  %v467_v3 = vmov (!%p140_p9), 0.0|0.0   ;;  %vm468_vm0 = vmmov (!%p140_p9), 0   ;;  %v469_v6 = vmov (!%p140_p9), 0.0  }
   0xe   : > { %143 = sbr.rel (%p140_p9) target bundleno = 254 (0xfe), region = 32  ;;  %355 = vmatprep.subr.bf16.mxu0 (!%p140_p9), %v467_v3  ;;  %v356_v4 = vpack.c.bf16 (!%p140_p9), %v168_v1, %v167_v0  ;;  %v170_v5 = vld [vmem:[%s607_s1 + $0x18] sm:$0xff] (!%p140_p9)  ;;  %352 = vmatprep.mubr.msk.f32.mxu0 (!%p140_p9), %vm468_vm0, %v469_v6  ;;  %p162_p10 = scmp.lt.s32.totalorder (!%p140_p9), %s512_s16, 1  ;;  %vm178_vm1 = vcmask (!%p140_p9), 261120   ;;  %v333_v9 = vld [vmem:[%s608_s2] ss:$0 sm:$0xff] (!%p140_p9) }
   0xf   : > { %v359_v7 = vpack.c.bf16 (!%p140_p9), %v170_v5, %v169_v2  ;;  %s159_s10 = sand.u32 (!%p140_p9), 1, %s457_s13   ;;  %s336_s20 = sshll.u32 (!%p140_p9), %s512_s16, 7  ;;  %vm252_vm2 = vcmask (!%p140_p9), 130048  }
  0x10   : > { %357 = vmatpush3.bf16.msra.mxu0 (!%p140_p9), %v356_v4  ;;  %s331_s11 = sshll.u32 (!%p140_p9), %s159_s10, 3  ;;  %s564_s28 = scalar_lea.hbm (!%p140_p9), %s609_s3, %s336_s20 }
  0x11   : > { %358 = vmatprep.subr.bf16.mxu0 (!%p140_p9), %v467_v3  ;;  %s161_s24 = scalar_lea.vmem (!%p140_p9), [#allocation2], %s331_s11  ;;  %s255_s29 = scalar_lea.sflag (!%p140_p9), [#allocation3], %s159_s10 }
  0x12   : > { %s268_s25 = sshll.u32 (!%p140_p9), %s161_s24, 4  ;;  %s566_s25 = int_to_ptr.vmem [resolvable:$true] %s268_s25 }
  0x13   : > { %s403_s30 = scalar_lea.vmem (!%p140_p9), %s566_s25, 128 }
  0x14   : > { %360 = vmatpush3.bf16.msra.mxu0 (!%p140_p9), %v359_v7  ;;  %p404_p11 = scmp.ne.s32.totalorder (!%p140_p9), %s566_s25, %s403_s30 }
  0x15   : > { %s163_s5 = scalar_select %p162_p10, %s512_s16, 1 }
  0x16   : > { %p405_p12 = pnand %p404_p11, %p529_p5  ;;  %s470_s16 = smov [#allocation2]  }
  0x17   : > { %s332_s6 = sshll.u32 %s163_s5, 3  ;;  %s407_s4 = sshll.u32 %s470_s16, 4  ;;  %s408_s4 = int_to_ptr.vmem [resolvable:$false] %s407_s4 }
  0x18   : > { %s165_s9 = scalar_lea.vmem %s606_s0, %s332_s6  ;;  %p406_p13 = pneg %p405_p12 }
  0x19   : > { %v166_v8 = vld [vmem:[%s165_s9] sm:$0xff]  ;;  %s409_s5 = scalar_lea.vmem %s408_s4, 256  ;;  %p410_p0 = scmp.lt.s32.totalorder %s566_s25, %s408_s4 }
  0x1a   : > { %353 = vmatmul.mubr.msk.f32.vlgmr.msra.gmra.mrb[0].mxu0 %vm178_vm1, %v166_v8  ;;  %p411_p1 = scmp.lt.s32.totalorder %s409_s5, %s403_s30 }
  0x1c   : > { %p412_p2 = por %p411_p1, %p410_p0 }
  0x1e   : > { %p413_p3 = pnand %p412_p2, %p406_p13 }
  0xed   : > { %v248_v10 = vpop.f32.mrb[0].mxu0 }
  0xee   : > { %v249_v11 = vadd.f32 %v333_v9, %v248_v10  ;;  %v354_v12 = vpop.f32.mrb[1].mxu0 }
  0xf0   : > { %253 = vst.msk [vmem:[%s161_s24] sm:$0xff] %vm252_vm2, %v249_v11 }
  0xf1   : > { %416 = shalt.err (!%p413_p3)
}
  0xf2   : > { %s417_s6 = scalar_lea.hbm %s564_s28, 128  ;;  %s421_s9 = scalar_lea.hbm %s609_s3, 256 }
  0xf3   : > { %p418_p4 = scmp.ne.s32.totalorder %s564_s28, %s417_s6  ;;  %p422_p9 = scmp.lt.u32.totalorder %s564_s28, %s609_s3 }
  0xf4   : > { %p423_p10 = scmp.lt.u32.totalorder %s421_s9, %s417_s6  ;;  %p425_p12 = scmp.lt.u32.totalorder %s417_s6, %s564_s28 }
  0xf5   : > { %p419_p7 = pnand %p418_p4, %p529_p5 }
  0xf6   : > { %p424_p11 = por %p423_p10, %p422_p9 }
  0xf7   : > { %p420_p8 = pneg %p419_p7 }
  0xf8   : > { %p426_p13 = por %p425_p12, %p424_p11 }
  0xfa   : > { %p427_p0 = pnand %p426_p13, %p420_p8 }
  0xfc   : > { %430 = shalt.err (!%p427_p0)
}
  0xfd   : > { %361 = dma.vmem_to_hbm [thread:$0]  (%p529_p5), %s566_s25, 128, %s564_s28, %s255_s29  }
  0xfe PF: > { %p367_p1 = scmp.ge.s32.totalorder %s465_s15, 2  ;;  %s280_s17 = sand.u32 1, %s453_s12  }
  0xff   : > { %s281_s19 = scalar_lea.sflag [#allocation3], %s280_s17 }
 0x100   : > { %p364_p2 = pnand %p367_p1, %p533_p6 }
 0x102   : > { %448 = dma.done.wait (!%p364_p2), %s281_s19, 128  }
 0x103   : > { %450 = vsyncadd (!%p364_p2), %s281_s19, 4294967168  ;;  %p13_p3 = scmp.ge.s32.totalorder %s516_s18, 4   ;;  %s612_s12 = smov %s457_s13 }
 0x104   : > { %s613_s13 = smov %s461_s14  ;;  %s614_s14 = smov %s527_s21 }
 0x105   : > { %s615_s15 = smov %s516_s18  ;;  %15 = sbr.rel (!%p13_p3) target bundleno = 3 (0x3), region = 67 }
 0x10c   :  { %286 = vsyncpa [#allocation3], 1 }
 0x10d   :  { %288 = vsyncpa [#allocation3 + $0x1], 1 }

</bundles_post_ra>
